<compile_context>
chip_gen: v7x
topology: tpu7x:2x2x1
jax: 0.10.0
libtpu: 0.0.40
codegen_flags: <defaults>
</compile_context>

<pallas_src>
import functools

import jax
import jax.numpy as jnp
from jax import lax
from jax.experimental import pallas as pl
from jax.experimental.pallas import tpu as pltpu

FINAL_FEAT_DIM = 640   # ResNet12 final_feat_dim
N_CLASS = 64           # MiniImageNet


def _round_up(x, m):
    return ((x + m - 1) // m) * m


def _pad2(x, rows, cols):
    r, c = x.shape
    if r == rows and c == cols:
        return x
    return jnp.pad(x, ((0, rows - r), (0, cols - c)))


# ----------------------------- kernels -----------------------------------

def _linear_kernel(x_ref, w_ref, b_ref, o_ref, acc_ref):
    """Tiled o = x @ w + b.  grid = (M/tm, N/tn, K/tk); f32 accumulator in VMEM."""
    @pl.when(pl.program_id(2) == 0)
    def _():
        acc_ref[...] = jnp.zeros_like(acc_ref)

    acc_ref[...] += jnp.dot(x_ref[...], w_ref[...],
                            preferred_element_type=jnp.float32)

    @pl.when(pl.program_id(2) == pl.num_programs(2) - 1)
    def _():
        o_ref[...] = (acc_ref[...] + b_ref[...]).astype(o_ref.dtype)


def _fused_proto_kernel(x_ref, w_ref, b_ref, avg_ref, sel_ref, o_ref,
                        feat_ref, *, neg_inv_temp):
    """Fused encoder matmul (K-tiled) + prototypical scores.

    x_ref    : (Rp, tk)   bf16 episode images (rows zero-padded to Rp)
    w_ref    : (tk, D)    bf16 encoder weight tile
    b_ref    : (1, D)     f32 encoder bias
    avg_ref  : (n_way, Rp)           support-averaging matrix (1/n_shot entries)
    sel_ref  : (n_way*n_query, Rp)   query row-selection matrix
    o_ref    : (n_way*n_query, n_way) scores
    feat_ref : (Rp, D)    f32 scratch accumulating the episode features
    """
    k = pl.program_id(0)

    @pl.when(k == 0)
    def _():
        feat_ref[...] = jnp.zeros_like(feat_ref)

    feat_ref[...] += jnp.dot(x_ref[...], w_ref[...],
                             preferred_element_type=jnp.float32)

    @pl.when(k == pl.num_programs(0) - 1)
    def _():
        feat = feat_ref[...] + b_ref[...]                              # (Rp, D)
        proto = jnp.dot(avg_ref[...], feat,
                        preferred_element_type=jnp.float32)            # (n_way, D)
        zq = jnp.dot(sel_ref[...], feat,
                     preferred_element_type=jnp.float32)               # (NQ, D)
        # squared euclidean via ||q||^2 + ||p||^2 - 2 q.p  (D-reduction on the MXU)
        cross = lax.dot_general(zq, proto, (((1,), (1,)), ((), ())),
                                preferred_element_type=jnp.float32)    # (NQ, n_way)
        qn = jnp.sum(zq * zq, axis=-1, keepdims=True)                  # (NQ, 1)
        pn = jnp.sum(proto * proto, axis=-1, keepdims=True)            # (n_way, 1)
        dist = jnp.maximum(qn + pn.T - 2.0 * cross, 0.0)               # clamp cancellation
        o_ref[...] = dist * neg_inv_temp


# ----------------------------- wrappers -----------------------------------

def _pallas_linear(x, w, b, *, tm=128, tn=128, tk=512):
    """x:(M,K) @ w:(K,N) + b:(1,N) -> (M,N) f32, bf16 MXU inputs, tiled/pipelined."""
    M, K = x.shape
    N = w.shape[1]
    tm = min(tm, _round_up(M, 8))
    tn = min(tn, _round_up(N, 128))
    tk = min(tk, _round_up(K, 128))
    Mp, Kp, Np = _round_up(M, tm), _round_up(K, tk), _round_up(N, tn)

    xp = _pad2(x.astype(jnp.bfloat16), Mp, Kp)
    wp = _pad2(w.astype(jnp.bfloat16), Kp, Np)
    bp = _pad2(b.astype(jnp.float32), 1, Np)

    out = pl.pallas_call(
        _linear_kernel,
        out_shape=jax.ShapeDtypeStruct((Mp, Np), jnp.float32),
        grid=(Mp // tm, Np // tn, Kp // tk),
        in_specs=[
            pl.BlockSpec((tm, tk), lambda i, j, k: (i, k)),
            pl.BlockSpec((tk, tn), lambda i, j, k: (k, j)),
            pl.BlockSpec((1, tn), lambda i, j, k: (0, j)),
        ],
        out_specs=pl.BlockSpec((tm, tn), lambda i, j, k: (i, j)),
        scratch_shapes=[pltpu.VMEM((tm, tn), jnp.float32)],
        compiler_params=pltpu.CompilerParams(
            dimension_semantics=("parallel", "parallel", "arbitrary")),
    )(xp, wp, bp)
    return out[:M, :N]


def _pallas_proto_scores_fused(x, w, b, avg_mat, sel_q, temperature, *, tk=512):
    """Fused encoder + prototypical scores for one episode."""
    n_rows, K = x.shape
    D = w.shape[1]
    n_way = avg_mat.shape[0]
    n_q = sel_q.shape[0]

    Rp = _round_up(n_rows, 8)
    tk = min(tk, _round_up(K, 128))
    Kp = _round_up(K, tk)

    xp = _pad2(x.astype(jnp.bfloat16), Rp, Kp)
    wp = _pad2(w.astype(jnp.bfloat16), Kp, D)
    avgp = _pad2(avg_mat.astype(jnp.float32), n_way, Rp)
    selp = _pad2(sel_q.astype(jnp.float32), n_q, Rp)
    bp = b.astype(jnp.float32)

    kernel = functools.partial(_fused_proto_kernel,
                               neg_inv_temp=-1.0 / float(temperature))
    return pl.pallas_call(
        kernel,
        out_shape=jax.ShapeDtypeStruct((n_q, n_way), jnp.float32),
        grid=(Kp // tk,),
        in_specs=[
            pl.BlockSpec((Rp, tk), lambda k: (0, k)),
            pl.BlockSpec((tk, D), lambda k: (k, 0)),
            pl.BlockSpec((1, D), lambda k: (0, 0)),
            pl.BlockSpec((n_way, Rp), lambda k: (0, 0)),
            pl.BlockSpec((n_q, Rp), lambda k: (0, 0)),
        ],
        out_specs=pl.BlockSpec((n_q, n_way), lambda k: (0, 0)),
        scratch_shapes=[pltpu.VMEM((Rp, D), jnp.float32)],
        compiler_params=pltpu.CompilerParams(
            dimension_semantics=("arbitrary",)),
    )(xp, wp, bp, avgp, selp)


class Args:
    def __init__(self, n_way, n_shot, n_query, temperature):
        self.n_way = n_way
        self.n_shot = n_shot
        self.n_query = n_query
        self.temperature = temperature
        self.dataset = "MiniImageNet"


class BaselineTrain:
    """JAX/Pallas port of methods/baselinetrain.py::BaselineTrain."""

    def __init__(self, args, in_dim, key):
        self.args = args
        k_enc, k_cls = jax.random.split(key)
        # synthetic encoder: linear [in_dim -> 640], stored bf16 (MXU-native)
        self.enc_w = (jax.random.normal(k_enc, (in_dim, FINAL_FEAT_DIM), jnp.float32)
                      * (1.0 / jnp.sqrt(in_dim))).astype(jnp.bfloat16)
        self.enc_b = jnp.zeros((1, FINAL_FEAT_DIM), jnp.float32)
        # classifier (defined in __init__ of the PyTorch module, unused in forward)
        self.cls_w = (jax.random.normal(k_cls, (FINAL_FEAT_DIM, N_CLASS), jnp.float32)
                      * (1.0 / jnp.sqrt(FINAL_FEAT_DIM))).astype(jnp.bfloat16)
        self.cls_b = jnp.zeros((1, N_CLASS), jnp.float32)  # bias.data.fill_(0)

    def encoder(self, data_nchw):
        n = data_nchw.shape[0]
        x = data_nchw.reshape(n, -1)
        return _pallas_linear(x, self.enc_w, self.enc_b)

    def classifier(self, feature):
        return _pallas_linear(feature, self.cls_w, self.cls_b)

    def _episode_matrices(self):
        """Support-averaging and query-selection matrices for one episode."""
        a = self.args
        nk = a.n_shot + a.n_query
        n_rows = a.n_way * nk
        row = jnp.arange(n_rows)
        row_way = row // nk
        row_pos = row % nk
        is_support = row_pos < a.n_shot
        avg_mat = jnp.where(
            is_support[None, :] & (row_way[None, :] == jnp.arange(a.n_way)[:, None]),
            1.0 / a.n_shot, 0.0).astype(jnp.float32)                    # (n_way, n_rows)
        qg = jnp.arange(a.n_way * a.n_query)
        q_rows = (qg // a.n_query) * nk + a.n_shot + (qg % a.n_query)
        sel_q = (q_rows[:, None] == row[None, :]).astype(jnp.float32)   # (NQ, n_rows)
        return avg_mat, sel_q

    def forward(self, data, mode="train"):
        args = self.args
        if mode in ("val", "test"):
            # data: (n_way, n_shot + n_query, C, H, W) -> fused encoder + proto scores
            n_rows = args.n_way * (args.n_shot + args.n_query)
            x = data.reshape(n_rows, -1)
            avg_mat, sel_q = self._episode_matrices()
            return _pallas_proto_scores_fused(
                x, self.enc_w, self.enc_b, avg_mat, sel_q, args.temperature)
        else:
            # data: (N, C, H, W)
            return self.encoder(data)


# ----------------------------- main ---------------------------------------

if __name__ == "__main__":
    key = jax.random.PRNGKey(0)
    k_model, k_train, k_eval = jax.random.split(key, 3)

    n_way, n_shot, n_query = 4, 1, 2
    C, H, W = 3, 8, 8
    args = Args(n_way=n_way, n_shot=n_shot, n_query=n_query, temperature=1.0)

    model = BaselineTrain(args, in_dim=C * H * W, key=k_model)

    def ref_linear(x2d, w, b):
        return jnp.dot(x2d.astype(jnp.bfloat16).astype(jnp.float32),
                       w.astype(jnp.float32)) + b

    # ---- train mode: returns features ----
    data_train = jax.random.normal(k_train, (6, C, H, W), jnp.float32)
    feat = model.forward(data_train, mode="train")
    feat = jax.block_until_ready(feat)
    assert feat.shape == (6, FINAL_FEAT_DIM)
    feat_ref = ref_linear(data_train.reshape(6, -1), model.enc_w, model.enc_b)
    assert bool(jnp.allclose(feat, feat_ref, rtol=2e-2, atol=2e-2))

    # ---- val mode: prototypical scores ----
    data_val = jax.random.normal(
        k_eval, (n_way, n_shot + n_query, C, H, W), jnp.float32)
    scores = model.forward(data_val, mode="val")
    scores = jax.block_until_ready(scores)
    assert scores.shape == (n_way * n_query, n_way)

    # reference: encoder -> proto mean -> -||q - p||^2 / T
    n_rows = n_way * (n_shot + n_query)
    fr = ref_linear(data_val.reshape(n_rows, -1), model.enc_w, model.enc_b)
    fr = fr.reshape(n_way, n_shot + n_query, -1)
    proto_ref = fr[:, :n_shot].mean(axis=1)
    zq_ref = fr[:, n_shot:].reshape(n_way * n_query, -1)
    dist_ref = jnp.sum((zq_ref[:, None, :] - proto_ref[None, :, :]) ** 2, axis=-1)
    scores_ref = -dist_ref / args.temperature
    assert bool(jnp.allclose(scores, scores_ref, rtol=2e-2, atol=2e-2))
    assert bool(jnp.all(jnp.isfinite(scores)))

    print("KERNEL_OK")
</pallas_src>

<mosaic_0001>
module attributes {stable_mosaic.version = 11 : i64} {
  func.func @_linear_kernel(%arg0: i32, %arg1: i32, %arg2: i32, %arg3: memref<8x256xbf16, #tpu.memory_space<vmem>>, %arg4: memref<256x128xbf16, #tpu.memory_space<vmem>>, %arg5: memref<1x128xf32, #tpu.memory_space<vmem>>, %arg6: memref<8x128xf32, #tpu.memory_space<vmem>>, %arg7: memref<8x128xf32, #tpu.memory_space<vmem>>) attributes {dimension_semantics = [#tpu.dimension_semantics<parallel>, #tpu.dimension_semantics<parallel>, #tpu.dimension_semantics<arbitrary>], iteration_bounds = array<i64: 1, 5, 1>, scalar_prefetch = 0 : i64, scratch_operands = 1 : i64, tpu.core_type = #tpu.core_type<tc>, window_params = [{transform_indices = @transform_0, window_bounds = array<i64: 8, 256>}, {transform_indices = @transform_1, window_bounds = array<i64: 256, 128>}, {transform_indices = @transform_2, window_bounds = array<i64: 1, 128>}, {transform_indices = @transform_3, window_bounds = array<i64: 8, 128>}]} {
    %c0_i32 = arith.constant 0 : i32
    %0 = arith.cmpi eq, %arg2, %c0_i32 : i32
    %1 = arith.extui %0 : i1 to i32
    %c0_i32_0 = arith.constant 0 : i32
    %2 = arith.cmpi ne, %1, %c0_i32_0 : i32
    scf.if %2 {
      %cst_10 = arith.constant 0.000000e+00 : f32
      %12 = vector.broadcast %cst_10 : f32 to vector<8x128xf32>
      %c0_11 = arith.constant 0 : index
      %c0_12 = arith.constant 0 : index
      %13 = vector.load %arg7[%c0_11, %c0_12] : memref<8x128xf32, #tpu.memory_space<vmem>>, vector<8x128xf32>
      tpu.vector_store %arg7[%c0_11, %c0_12], %12 {strides = array<i32>} : memref<8x128xf32, #tpu.memory_space<vmem>>, vector<8x128xf32>,
    } else {
    }
    %c0 = arith.constant 0 : index
    %c0_1 = arith.constant 0 : index
    %3 = vector.load %arg7[%c0, %c0_1] : memref<8x128xf32, #tpu.memory_space<vmem>>, vector<8x128xf32>
    %c0_2 = arith.constant 0 : index
    %c0_3 = arith.constant 0 : index
    %4 = vector.load %arg3[%c0_2, %c0_3] : memref<8x256xbf16, #tpu.memory_space<vmem>>, vector<8x256xbf16>
    %c0_4 = arith.constant 0 : index
    %c0_5 = arith.constant 0 : index
    %5 = vector.load %arg4[%c0_4, %c0_5] : memref<256x128xbf16, #tpu.memory_space<vmem>>, vector<256x128xbf16>
    %cst = arith.constant dense<0.000000e+00> : vector<8x128xf32>
    %6 = tpu.matmul %4, %5, %cst {dimension_numbers = #tpu.dot_dimension_numbers<[1], [0], [0], [1], [0, 0, 1, 1], [], []>} : vector<8x256xbf16>, vector<256x128xbf16>, vector<8x128xf32> -> vector<8x128xf32>
    %7 = arith.addf %3, %6 : vector<8x128xf32>
    %c0_6 = arith.constant 0 : index
    %c0_7 = arith.constant 0 : index
    %8 = vector.load %arg7[%c0_6, %c0_7] : memref<8x128xf32, #tpu.memory_space<vmem>>, vector<8x128xf32>
    tpu.vector_store %arg7[%c0_6, %c0_7], %7 {strides = array<i32>} : memref<8x128xf32, #tpu.memory_space<vmem>>, vector<8x128xf32>,
    %c0_i32_8 = arith.constant 0 : i32
    %9 = arith.cmpi eq, %arg2, %c0_i32_8 : i32
    %10 = arith.extui %9 : i1 to i32
    %c0_i32_9 = arith.constant 0 : i32
    %11 = arith.cmpi ne, %10, %c0_i32_9 : i32
    scf.if %11 {
      %c0_10 = arith.constant 0 : index
      %c0_11 = arith.constant 0 : index
      %12 = vector.load %arg7[%c0_10, %c0_11] : memref<8x128xf32, #tpu.memory_space<vmem>>, vector<8x128xf32>
      %c0_12 = arith.constant 0 : index
      %c0_13 = arith.constant 0 : index
      %13 = vector.load %arg5[%c0_12, %c0_13] : memref<1x128xf32, #tpu.memory_space<vmem>>, vector<1x128xf32>
      %14 = vector.broadcast %13 : vector<1x128xf32> to vector<8x128xf32>
      %15 = arith.addf %12, %14 : vector<8x128xf32>
      %c0_14 = arith.constant 0 : index
      %c0_15 = arith.constant 0 : index
      %16 = vector.load %arg6[%c0_14, %c0_15] : memref<8x128xf32, #tpu.memory_space<vmem>>, vector<8x128xf32>
      tpu.vector_store %arg6[%c0_14, %c0_15], %15 {strides = array<i32>} : memref<8x128xf32, #tpu.memory_space<vmem>>, vector<8x128xf32>,
    } else {
    }
    return
  }
  func.func @transform_0(%arg0: i32, %arg1: i32, %arg2: i32) -> (i32, i32) {
    %c0_i32 = arith.constant 0 : i32
    return %arg0, %arg2 : i32, i32
  }
  func.func @transform_1(%arg0: i32, %arg1: i32, %arg2: i32) -> (i32, i32) {
    %c0_i32 = arith.constant 0 : i32
    return %arg2, %arg1 : i32, i32
  }
  func.func @transform_2(%arg0: i32, %arg1: i32, %arg2: i32) -> (i32, i32) {
    %c0_i32 = arith.constant 0 : i32
    %c0_i32_0 = arith.constant 0 : i32
    return %c0_i32, %arg1 : i32, i32
  }
  func.func @transform_3(%arg0: i32, %arg1: i32, %arg2: i32) -> (i32, i32) {
    %c0_i32 = arith.constant 0 : i32
    return %arg0, %arg1 : i32, i32
  }
}

</mosaic_0001>

<bundles_post_ra>
// kernel: tpu_custom_call.1
= control target key start
LH: loop header
LB: loop body
LE: loop exit
PB: predicated region body
PF: predicated region fallthrough
CT: control target
= control target key end

     0   :  { %8 = vsyncpa [#allocation4], 0  ;;  %s1143_s0 = inlined_call_operand.hbm [shape: bf16[8,256], index: 0, kind: input, shape index: {}]   ;;  %s1144_s1 = inlined_call_operand.hbm [shape: bf16[256,640], index: 1, kind: input, shape index: {}]   ;;  %s1145_s2 = inlined_call_operand.vmem [shape: f32[1,640], index: 2, kind: input, shape index: {}]   ;;  %s1146_s3 = inlined_call_operand.hbm [shape: f32[8,640], index: 3, kind: output, shape index: {}]  }
   0x1   :  { %9 = vsyncpa [#allocation7], 0 }
   0x2   :  { %11 = vsyncpa [#allocation7 + $0x1], 0 }
   0x3   :  { %12 = vsyncpa [#allocation5], 0 }
   0x4   :  { %14 = vsyncpa [#allocation5 + $0x1], 0  ;;  %s902_s12 = smov 0   ;;  %s904_s13 = smov 0  }
   0x5   :  { %s906_s14 = smov 0   ;;  %s908_s15 = smov 0  }
   0x6   :  { %s910_s16 = smov 0   ;;  %s912_s17 = smov 0  }
   0x7 LB: > { %s580_s18 = sadd.s32 4294967295, %s874_s17   ;;  %s581_s19 = sadd.s32 4294967294, %s874_s17   ;;  %s874_s17 = sphi %s912_s17, %s20_s17   ;;  %s870_s16 = sphi %s910_s16, %s1173_s16   ;;  %s866_s15 = sphi %s908_s15, %s1172_s15   ;;  %s862_s14 = sphi %s906_s14, %s1171_s14   ;;  %s858_s13 = sphi %s904_s13, %s1170_s13   ;;  %s854_s12 = sphi %s902_s12, %s1169_s12  }
   0x8   : > { %s76_s20 = sadd.s32 1, %s862_s14  ;;  %p83_p0 = scmp.ne.s32.totalorder %s862_s14, %s858_s13 }
   0x9   : > { %p84_p1 = scmp.eq.s32.totalorder %s874_s17, 0  ;;  %p89_p2 = scmp.ne.s32.totalorder %s858_s13, %s854_s12 }
   0xa   : > { %p940_p3 = scmp.eq.s32.totalorder %s580_s18, 0  ;;  %p141_p4 = scmp.eq.s32.totalorder %s580_s18, 4 }
   0xb   : > { %p944_p5 = por %p84_p1, %p83_p0  ;;  %p147_p6 = scmp.eq.s32.totalorder %s581_s19, 4 }
   0xc   : > { %s1153_s21 = scalar_select %p940_p3, 1, 0 }
   0xd   : > { %p950_p7 = por %p940_p3, %p89_p2  ;;  %p954_p8 = por %p141_p4, %p83_p0 }
   0xe   : > { %p958_p9 = por %p147_p6, %p89_p2  ;;  %p582_p10 = scmp.ge.s32.totalorder %s874_s17, 1 }
   0xf   : > { %s1155_s23 = scalar_select %p950_p7, 1, 0 }
  0x10   : > { %s1156_s24 = scalar_select %p954_p8, 1, 0 }
  0x11   : > { %s1157_s25 = scalar_select %p958_p9, 1, 0 }
  0x12   : > { %p154_p11 = scmp.lt.s32.totalorder %s874_s17, 6  ;;  %s876_s27 = smov [#allocation3]  }
  0x13   : > { %s172_s28 = sshll.u32 %s876_s27, 4  ;;  %p657_p13 = scmp.lt.s32.totalorder %s874_s17, 5  ;;  %s173_s28 = int_to_ptr.vmem [resolvable:$true] %s172_s28 }
  0x14   : > { %p964_p12 = pnand %p582_p10, %p154_p11  ;;  %s35_s4 = sadd.s32 1, %s870_s16 }
  0x15   : > { %p973_p1 = pnand %p657_p13, %p944_p5  ;;  %p984_p4 = scmp.ge.s32.totalorder %s35_s4, 5 }
  0x16   : > { %s1158_s26 = scalar_select %p964_p12, 1, 0 }
  0x17   : > { %p644_p0 = pneg %p964_p12  ;;  %s183_s6 = sand.u32 1, %s862_s14  }
  0x18   : > { %s1159_s29 = scalar_select %p973_p1, 1, 0 }
  0x19   : > { %p979_p2 = pnand %p644_p0, %p940_p3  ;;  %s730_s9 = scalar_lea.hbm %s1143_s0, 128 }
  0x1a   : > { %s1161_s5 = scalar_select %p984_p4, 1, 0 }
  0x1b   : > { %p731_p5 = scmp.ne.s32.totalorder %s1143_s0, %s730_s9  ;;  %p732_p6 = pneg %p979_p2 }
  0x1c   : > { %p737_p13 = scmp.lt.u32.totalorder %s730_s9, %s1143_s0 }
  0x1d   : > { %p733_p10 = pnand %p732_p6, %p731_p5 }
  0x1f   : > { %p734_p11 = pneg %p733_p10 }
  0x21   : > { %p739_p0 = pnand %p737_p13, %p734_p11 }
  0x23   : > { %742 = shalt.err (!%p739_p0)
}
  0x24   : > { %s743_s22 = scalar_lea.vmem %s173_s28, 128  ;;  %p751_p3 = scmp.lt.s32.totalorder %s173_s28, %s173_s28 }
  0x25   : > { %p744_p9 = scmp.ne.s32.totalorder %s173_s28, %s743_s22  ;;  %p752_p12 = scmp.lt.s32.totalorder %s743_s22, %s743_s22 }
  0x27   : > { %p746_p8 = pnand %p744_p9, %p732_p6  ;;  %p753_p1 = por %p752_p12, %p751_p3 }
  0x29   : > { %p747_p7 = pneg %p746_p8 }
  0x2b   : > { %p754_p4 = pnand %p753_p1, %p747_p7 }
  0x2d   : > { %757 = shalt.err (!%p754_p4)
}
  0x2e   : > { %647 = dma.hbm_to_vmem [thread:$0]  (!%p979_p2), %s1143_s0, 128, %s173_s28, [#allocation4]  }
  0x2f   : > { %p1162_p9 = scmp.ne.s32.totalorder %s1161_s5, 0  ;;  %s585_s8 = sshll.u32 %s183_s6, 7 }
  0x30   : > { %s586_s10 = sshll.u32 %s870_s16, 6  ;;  %s187_s19 = scalar_lea.vmem [#allocation6], %s585_s8 }
  0x31   : > { %s1175_s4 = smov (%p1162_p9, %s35_s4), 0  ;;  %s1015_s18 = scalar_lea.hbm %s1144_s1, %s586_s10 }
  0x32   : > { %s72_s9 = ssub.s32 %s870_s16, %s1175_s4  ;;  %s196_s22 = sshll.u32 %s187_s19, 4  ;;  %s1022_s22 = int_to_ptr.vmem [resolvable:$true] %s196_s22 }
  0x33   : > { %p74_p3 = scmp.eq.s32.totalorder %s72_s9, 0  ;;  %s1024_s5 = scalar_lea.sflag [#allocation7], %s183_s6 }
  0x34   : > { %s758_s27 = scalar_lea.hbm %s1015_s18, 2048  ;;  %p1163_p8 = scmp.ne.s32.totalorder %s1159_s29, 0 }
  0x35   : > { %s1020_s28 = scalar_select %p74_p3, %s862_s14, %s76_s20  }
  0x36   : > { %p759_p7 = scmp.ne.s32.totalorder %s1015_s18, %s758_s27  ;;  %p760_p12 = pneg %p1163_p8 }
  0x37   : > { %s763_s8 = scalar_lea.hbm %s1144_s1, 10240  ;;  %p764_p4 = scmp.lt.u32.totalorder %s1015_s18, %s1144_s1 }
  0x38   : > { %p761_p1 = pnand %p760_p12, %p759_p7  ;;  %p765_p5 = scmp.lt.u32.totalorder %s763_s8, %s758_s27 }
  0x39   : > { %p767_p10 = scmp.lt.u32.totalorder %s758_s27, %s1015_s18 }
  0x3a   : > { %p762_p2 = pneg %p761_p1  ;;  %p766_p6 = por %p765_p5, %p764_p4 }
  0x3c   : > { %p768_p11 = por %p767_p10, %p766_p6 }
  0x3e   : > { %p769_p13 = pnand %p768_p11, %p762_p2 }
  0x40   : > { %772 = shalt.err (!%p769_p13)
}
  0x41   : > { %s773_s20 = scalar_lea.vmem %s1022_s22, 2048  ;;  %s877_s6 = smov [#allocation6]  }
  0x42   : > { %p774_p0 = scmp.ne.s32.totalorder %s1022_s22, %s773_s20  ;;  %s778_s11 = sshll.u32 %s877_s6, 4  ;;  %s779_s11 = int_to_ptr.vmem [resolvable:$false] %s778_s11 }
  0x43   : > { %s780_s19 = scalar_lea.vmem %s779_s11, 4096  ;;  %p781_p7 = scmp.lt.s32.totalorder %s1022_s22, %s779_s11 }
  0x44   : > { %p776_p9 = pnand %p774_p0, %p760_p12  ;;  %p782_p1 = scmp.lt.s32.totalorder %s780_s19, %s773_s20 }
  0x46   : > { %p777_p3 = pneg %p776_p9  ;;  %p783_p4 = por %p782_p1, %p781_p7 }
  0x48   : > { %p784_p5 = pnand %p783_p4, %p777_p3 }
  0x4a   : > { %787 = shalt.err (!%p784_p5)
}
  0x4b   : > { %s878_s27 = smov 320   ;;  %s879_s7 = smov 64  }
  0x4c   : > { %s880_s9 = smov 4   ;;  %p1164_p12 = scmp.ne.s32.totalorder %s1158_s26, 0 }
  0x4d   : > { %651 = dma.hbm_to_vmem [thread:$0]  (!%p1163_p8), %s1015_s18, 2048, %s1022_s22, %s1024_s5, %s878_s27, %s879_s7, %s880_s9  }
  0x4e   : > { %214 = sbr.rel (%p1164_p12) target bundleno = 354 (0x162), region = 32  ;;  %p1165_p2 = scmp.ne.s32.totalorder (!%p1164_p12), %s1153_s21, 0 }
  0x55   : > { %841 = dma.done.wait (%p1165_p2), [#allocation4], 128  }
  0x56   : > { %843 = vsyncadd (%p1165_p2), [#allocation4], 4294967168  ;;  %s1059_s8 = sand.u32 1, %s858_s13   ;;  %p1166_p8 = scmp.ne.s32.totalorder %s1155_s23, 0 }
  0x57   : > { %s589_s10 = sshll.u32 %s1059_s8, 7  ;;  %s221_s30 = scalar_lea.sflag [#allocation7], %s1059_s8 }
  0x58   : > { %s1063_s20 = scalar_lea.vmem [#allocation6], %s589_s10 }
  0x59   : > { %845 = dma.done.wait (%p1166_p8), %s221_s30, 2048  }
  0x5a   : > { %847 = vsyncadd (%p1166_p8), %s221_s30, 4294965248  ;;  %v712_v0 = vld [vmem:[%s1063_s20 + $0x40] sm:$0xff]   ;;  %v714_v2 = vld [vmem:[%s1063_s20 + $0x48] sm:$0xff]   ;;  %p252_p6 = scmp.lt.s32.totalorder %s866_s15, 4  ;;  %s590_s23 = sshll.u32 %s1059_s8, 3 }
  0x5b   : > { %v713_v1 = vld [vmem:[%s1063_s20] sm:$0xff]   ;;  %614 = vmatprep.subr.bf16.mxu0 %v712_v0  ;;  %v715_v3 = vld [vmem:[%s1063_s20 + $0x8] sm:$0xff]   ;;  %v716_v4 = vld [vmem:[%s1063_s20 + $0x50] sm:$0xff]   ;;  %s611_s22 = sshll.u32 %s866_s15, 7  ;;  %s249_s5 = scalar_lea.vmem [#allocation8], %s590_s23 }
  0x5c   : > { %615 = vmatpush3.bf16.msra.mxu0 %v713_v1  ;;  %v717_v5 = vld [vmem:[%s1063_s20 + $0x10] sm:$0xff]   ;;  %v718_v6 = vld [vmem:[%s1063_s20 + $0x58] sm:$0xff]   ;;  %v720_v8 = vld [vmem:[%s1063_s20 + $0x60] sm:$0xff]   ;;  %s253_s21 = scalar_select %p252_p6, %s866_s15, 4 }
  0x5d   : > { %616 = vmatprep.subr.bf16.mxu0 %v714_v2  ;;  %v719_v7 = vld [vmem:[%s1063_s20 + $0x18] sm:$0xff]   ;;  %v721_v9 = vld [vmem:[%s1063_s20 + $0x20] sm:$0xff]   ;;  %v722_v10 = vld [vmem:[%s1063_s20 + $0x68] sm:$0xff]   ;;  %s469_s6 = sshll.u32 %s249_s5, 4  ;;  %s1095_s27 = scalar_lea.hbm %s1146_s3, %s611_s22  ;;  %s1097_s6 = int_to_ptr.vmem [resolvable:$true] %s469_s6 }
  0x5e   : > { %v262_v11 = vld [vmem:[#allocation3] sm:$0xff]  ;;  %v723_v13 = vld [vmem:[%s1063_s20 + $0x28] sm:$0xff]   ;;  %v724_v14 = vld [vmem:[%s1063_s20 + $0x70] sm:$0xff]   ;;  %s254_s18 = scalar_lea.vmem %s1145_s2, %s253_s21  ;;  %s454_s7 = scalar_lea.sflag [#allocation5], %s1059_s8 }
  0x5f   : > { %v592_v12 = vcombine.high %v262_v11, %v262_v11  ;;  %v725_v15 = vld [vmem:[%s1063_s20 + $0x30] sm:$0xff]   ;;  %v726_v16 = vld [vmem:[%s1063_s20 + $0x78] sm:$0xff]   ;;  %v591_v18 = vcombine.low %v262_v11, %v262_v11  ;;  %s788_s9 = scalar_lea.vmem %s1097_s6, 128  ;;  %p1167_p11 = scmp.ne.s32.totalorder %s1156_s24, 0 }
  0x60   : > { %617 = vmatpush3.bf16.msra.mxu0 %v715_v3  ;;  %v727_v17 = vld [vmem:[%s1063_s20 + $0x38] sm:$0xff]   ;;  %p789_p10 = scmp.ne.s32.totalorder %s1097_s6, %s788_s9  ;;  %s881_s15 = smov [#allocation8]  }
  0x61   : > { %618 = vmatprep.subr.bf16.mxu0 %v716_v4  ;;  %430 = vmatprep.mubr.bf16.mxu0 %v592_v12  ;;  %v609_v21 = vld [vmem:[%s254_s18] ss:$0 sm:$0xff]  ;;  %s792_s10 = sshll.u32 %s881_s15, 4  ;;  %s793_s10 = int_to_ptr.vmem [resolvable:$false] %s792_s10 }
  0x62   : > { %p790_p13 = pnand %p789_p10, %p1167_p11  ;;  %s794_s30 = scalar_lea.vmem %s793_s10, 256 }
  0x63   : > { %p795_p9 = scmp.lt.s32.totalorder %s1097_s6, %s793_s10  ;;  %p796_p3 = scmp.lt.s32.totalorder %s794_s30, %s788_s9 }
  0x64   : > { %619 = vmatpush3.bf16.msra.mxu0 %v717_v5  ;;  %p791_p0 = pneg %p790_p13 }
  0x65   : > { %620 = vmatprep.subr.bf16.mxu0 %v718_v6  ;;  %p797_p7 = por %p796_p3, %p795_p9 }
  0x67   : > { %p798_p1 = pnand %p797_p7, %p791_p0 }
  0x68   : > { %621 = vmatpush3.bf16.msra.mxu0 %v719_v7 }
  0x69   : > { %622 = vmatprep.subr.bf16.mxu0 %v720_v8 }
  0x6c   : > { %623 = vmatpush3.bf16.msra.mxu0 %v721_v9 }
  0x6d   : > { %624 = vmatprep.subr.bf16.mxu0 %v722_v10 }
  0x70   : > { %625 = vmatpush3.bf16.msra.mxu0 %v723_v13 }
  0x71   : > { %626 = vmatprep.subr.bf16.mxu0 %v724_v14 }
  0x74   : > { %627 = vmatpush3.bf16.msra.mxu0 %v725_v15 }
  0x75   : > { %628 = vmatprep.subr.bf16.mxu0 %v726_v16 }
  0x78   : > { %629 = vmatpush3.bf16.msra.mxu0 %v727_v17 }
  0x7b   : > { %431 = vmatmul.mubr.bf16.vlgmr.msra.gmra.mrb[0].mxu0 %v591_v18 }
 0x14e   : > { %v630_v19 = vpop.f32.mrb[0].mxu0 }
 0x14f   : > { %v631_v20 = vpop.f32.mrb[1].mxu0 }
 0x150   : > { %v632_v22 = vadd.f32 %v631_v20, %v630_v19  ;;  %v633_v23 = vpop.f32.mrb[2].mxu0 }
 0x151   : > { %v634_v24 = vpop.f32.mrb[3].mxu0 }
 0x152   : > { %v451_v25 = vadd.f32 %v632_v22, %v609_v21 }
 0x154   : > { %452 = vst [vmem:[%s249_s5] sm:$0xff] %v451_v25 }
 0x155   : > { %801 = shalt.err (!%p798_p1)
}
 0x156   : > { %s802_s8 = scalar_lea.hbm %s1095_s27, 128  ;;  %s806_s23 = scalar_lea.hbm %s1146_s3, 640 }
 0x157   : > { %p803_p4 = scmp.ne.s32.totalorder %s1095_s27, %s802_s8  ;;  %p807_p2 = scmp.lt.u32.totalorder %s1095_s27, %s1146_s3 }
 0x158   : > { %p808_p8 = scmp.lt.u32.totalorder %s806_s23, %s802_s8  ;;  %p810_p10 = scmp.lt.u32.totalorder %s802_s8, %s1095_s27 }
 0x159   : > { %p804_p5 = pnand %p803_p4, %p1167_p11 }
 0x15a   : > { %p809_p6 = por %p808_p8, %p807_p2 }
 0x15b   : > { %p805_p12 = pneg %p804_p5 }
 0x15c   : > { %p811_p13 = por %p810_p10, %p809_p6 }
 0x15e   : > { %p812_p0 = pnand %p811_p13, %p805_p12 }
 0x160   : > { %815 = shalt.err (!%p812_p0)
}
 0x161   : > { %642 = dma.vmem_to_hbm [thread:$0]  (%p1167_p11), %s1097_s6, 128, %s1095_s27, %s454_s7  }
 0x162 PF: > { %p659_p9 = scmp.ge.s32.totalorder %s874_s17, 2  ;;  %s481_s18 = sand.u32 1, %s854_s12  }
 0x163   : > { %p1168_p3 = scmp.ne.s32.totalorder %s1157_s25, 0  ;;  %s482_s22 = scalar_lea.sflag [#allocation5], %s481_s18 }
 0x165   : > { %p653_p7 = pnand %p659_p9, %p1168_p3 }
 0x167   : > { %849 = dma.done.wait (!%p653_p7), %s482_s22, 128  }
 0x168   : > { %851 = vsyncadd (!%p653_p7), %s482_s22, 4294967168  ;;  %s20_s17 = sadd.s32 1, %s874_s17   ;;  %s1169_s12 = smov %s858_s13 }
 0x169   : > { %p17_p1 = scmp.ge.s32.totalorder %s20_s17, 7   ;;  %s1170_s13 = smov %s862_s14 }
 0x16a   : > { %s1171_s14 = smov %s1020_s28  ;;  %s1172_s15 = smov %s870_s16 }
 0x16b   : > { %s1173_s16 = smov %s1175_s4  ;;  %19 = sbr.rel (!%p17_p1) target bundleno = 7 (0x7), region = 94 }
 0x172   :  { %487 = vsyncpa [#allocation4], 1 }
 0x173   :  { %489 = vsyncpa [#allocation4 + $0x1], 1 }
 0x174   :  { %490 = vsyncpa [#allocation7], 1 }
 0x175   :  { %492 = vsyncpa [#allocation7 + $0x1], 1 }
 0x176   :  { %493 = vsyncpa [#allocation5], 1 }
 0x177   :  { %495 = vsyncpa [#allocation5 + $0x1], 1 }

</bundles_post_ra>
